<compile_context>
chip_gen: v7x
topology: tpu7x:2x2x1
jax: 0.10.0
libtpu: 0.0.40
codegen_flags: <defaults>
</compile_context>

<pallas_src>
import jax
import jax.numpy as jnp
from jax.experimental import pallas as pl
from jax.experimental.pallas import tpu as pltpu


def _pos_embed_kernel(col_ref, row_ref, out_ref):
    # col_ref : (F, W)        -- col_embed[:W].T, pre-transposed in the wrapper
    # row_ref : (H, F)        -- row_embed[:H], natural layout
    # out_ref : (2F, T_H*W)   -- one spatial-tile output block (no batch axis)
    t = pl.program_id(0)                         # spatial tile index

    feat, width = col_ref.shape                  # F, W (static)
    t_h = out_ref.shape[-1] // width             # rows of H covered by this tile (static)

    col_t = col_ref[...]                                         # (F, W)
    h0 = pl.multiple_of(t * t_h, t_h)
    row_blk = row_ref[pl.ds(h0, t_h), :]                         # (T_H, F) dyn sublane slice
    row_t = jnp.transpose(row_blk)                               # (F, T_H) tiny XLU transpose

    for r in range(t_h):                                         # static, unrolled
        lo = r * width
        # channels [0, F): col pattern repeated for every row h
        out_ref[:feat, lo:lo + width] = col_t
        # channels [F, 2F): row value broadcast across the W lanes of row h
        out_ref[feat:, lo:lo + width] = jnp.broadcast_to(
            row_t[:, r:r + 1], (feat, width))


def _choose_h_tile(H, W, two_f, itemsize, max_block_bytes):
    """Largest T_H dividing H s.t. the (2F, T_H*W) block is lane-aligned & fits budget.

    Prefers 8-aligned tile heights (clean sublane slicing of the row table); only
    falls back to an unaligned T_H if no aligned one fits.
    """
    divisors = [t for t in range(H, 0, -1) if H % t == 0]

    def fits(t):
        lane_ok = ((t * W) % 128 == 0) or (t == H)
        return lane_ok and (two_f * t * W * itemsize) <= max_block_bytes

    for t in divisors:                      # aligned (or full-H) candidates first
        if fits(t) and (t % 8 == 0 or t == H):
            return t
    for t in divisors:                      # only reached if no aligned tile fits
        if fits(t):
            return t
    return H                                # always-legal fallback (full block)


def _vmem_limit_bytes():
    """Per-generation VMEM budget: capacity minus headroom, capped at 96 MiB."""
    cap = 64 * 1024 * 1024                  # conservative fallback (v7x per-TC)
    try:
        cap = int(pltpu.get_tpu_info().vmem_capacity_bytes)
    except Exception:
        pass
    return max(16 * 1024 * 1024, min(cap - 8 * 1024 * 1024, 96 * 1024 * 1024))


def position_embedding_learned(x, row_embed, col_embed, *, max_block_bytes=None):
    """Forward pass of PositionEmbeddingLearned.

    x:         (B, C, H, W)  -- only its shape is used (as in the PyTorch module)
    row_embed: (192, F)      -- learned row table
    col_embed: (640, F)      -- learned col table
    returns:   (B, 2F, H, W) float32
    """
    B = x.shape[0]
    H, W = x.shape[-2], x.shape[-1]
    F = row_embed.shape[1]
    out_dtype = jnp.float32

    # Embedding lookup with arange indices == row slice; transpose of the col table
    # hoisted out of the kernel (tiny, done once).
    col_t = jnp.transpose(col_embed[:W, :]).astype(out_dtype)   # (F, W)
    row_rows = row_embed[:H, :].astype(out_dtype)               # (H, F)

    vmem_limit = _vmem_limit_bytes()
    table_bytes = (F * W + H * F) * 4
    if max_block_bytes is None:
        # Only large residents: 2x double-buffered output block (+1 MiB headroom).
        max_block_bytes = max((vmem_limit - table_bytes) // 2 - (1 << 20), 256 * 1024)

    t_h = _choose_h_tile(H, W, 2 * F, 4, max_block_bytes)
    n_tiles = H // t_h

    flat = pl.pallas_call(
        _pos_embed_kernel,
        out_shape=jax.ShapeDtypeStruct((2 * F, H * W), out_dtype),
        grid_spec=pltpu.PrefetchScalarGridSpec(
            num_scalar_prefetch=0,
            grid=(n_tiles,),                                     # spatial tiles only
            in_specs=[
                pl.BlockSpec((F, W), lambda t: (0, 0)),          # col table (full, tiny)
                pl.BlockSpec((H, F), lambda t: (0, 0)),          # row table (full, tiny)
            ],
            out_specs=pl.BlockSpec((2 * F, t_h * W), lambda t: (0, t)),
        ),
        compiler_params=pltpu.CompilerParams(
            dimension_semantics=("parallel",),                   # megacore-shard tiles (v7x)
            vmem_limit_bytes=vmem_limit,
        ),
        cost_estimate=pl.CostEstimate(
            flops=0,
            transcendentals=0,
            bytes_accessed=(2 * F * H * W + F * W + H * F) * 4,
        ),
    )(col_t, row_rows)

    # Free row-major reshape back to CHW, then broadcast across the batch axis in
    # the wrapper (XLA fuses this into consumers; no B identical HBM writes in-kernel).
    pos = flat.reshape(2 * F, H, W)
    return jnp.broadcast_to(pos[None], (B, 2 * F, H, W))


def _reference(x, row_embed, col_embed):
    """Pure-JAX reference mirroring the PyTorch forward exactly."""
    B = x.shape[0]
    H, W = x.shape[-2], x.shape[-1]
    x_emb = col_embed[:W, :]                                   # (W, F)
    y_emb = row_embed[:H, :]                                   # (H, F)
    pos = jnp.concatenate(
        [
            jnp.broadcast_to(x_emb[None, :, :], (H, W, x_emb.shape[-1])),
            jnp.broadcast_to(y_emb[:, None, :], (H, W, y_emb.shape[-1])),
        ],
        axis=-1,
    )                                                          # (H, W, 2F)
    pos = jnp.transpose(pos, (2, 0, 1))                        # (2F, H, W)
    return jnp.broadcast_to(pos[None], (B,) + pos.shape)       # (B, 2F, H, W)


if __name__ == "__main__":
    # Deterministic parameter init: nn.init.uniform_ -> U[0, 1)
    num_pos_feats = 32  # small synthetic size (module default is 256)
    key = jax.random.PRNGKey(0)
    k_row, k_col, k_x = jax.random.split(key, 3)
    row_embed = jax.random.uniform(k_row, (192, num_pos_feats), dtype=jnp.float32)
    col_embed = jax.random.uniform(k_col, (640, num_pos_feats), dtype=jnp.float32)

    # Small NCHW conv-feature-like input.
    x = jax.random.normal(k_x, (2, 4, 16, 16), dtype=jnp.float32)

    ref = _reference(x, row_embed, col_embed)

    # 1) Default tiling (single spatial tile at this toy size).
    pos = jax.block_until_ready(position_embedding_learned(x, row_embed, col_embed))
    assert pos.shape == (2, 2 * num_pos_feats, 16, 16), pos.shape
    assert pos.dtype == jnp.float32
    assert jnp.allclose(pos, ref), "Pallas output mismatch vs reference (default tiling)"

    # 2) Force the multi-tile path (T_H = 8 -> 2 spatial tiles) to exercise the
    #    spatial tiling + dynamic row-table slice + lane-dense tile writeback.
    pos_tiled = jax.block_until_ready(
        position_embedding_learned(x, row_embed, col_embed, max_block_bytes=32 * 1024))
    assert pos_tiled.shape == (2, 2 * num_pos_feats, 16, 16)
    assert jnp.allclose(pos_tiled, ref), "Pallas output mismatch vs reference (tiled path)"

    print("KERNEL_OK")
</pallas_src>

<mosaic_0001>
module attributes {stable_mosaic.version = 11 : i64} {
  func.func @_pos_embed_kernel(%arg0: i32, %arg1: memref<32x16xf32, #tpu.memory_space<vmem>>, %arg2: memref<16x32xf32, #tpu.memory_space<vmem>>, %arg3: memref<64x256xf32, #tpu.memory_space<vmem>>) attributes {dimension_semantics = [#tpu.dimension_semantics<parallel>], iteration_bounds = array<i64: 1>, scalar_prefetch = 0 : i64, scratch_operands = 0 : i64, tpu.core_type = #tpu.core_type<tc>, window_params = [{pipeline_mode = #tpu.pipeline_mode<synchronous>, transform_indices = @transform_0, window_bounds = array<i64: 32, 16>}, {pipeline_mode = #tpu.pipeline_mode<synchronous>, transform_indices = @transform_1, window_bounds = array<i64: 16, 32>}, {transform_indices = @transform_2, window_bounds = array<i64: 64, 256>}]} {
    %c0 = arith.constant 0 : index
    %c0_0 = arith.constant 0 : index
    %0 = vector.load %arg1[%c0, %c0_0] : memref<32x16xf32, #tpu.memory_space<vmem>>, vector<32x16xf32>
    %c16_i32 = arith.constant 16 : i32
    %1 = arith.muli %arg0, %c16_i32 : i32
    %2 = tpu.assume_multiple %1, 16 : i32
    %3 = arith.index_cast %2 : i32 to index
    %c0_1 = arith.constant 0 : index
    %4 = vector.load %arg2[%3, %c0_1] : memref<16x32xf32, #tpu.memory_space<vmem>>, vector<16x32xf32>
    %5 = tpu.transpose %4, [1, 0] : vector<16x32xf32> -> vector<32x16xf32>
    %c0_2 = arith.constant 0 : index
    %c0_3 = arith.constant 0 : index
    %6 = vector.load %arg3[%c0_2, %c0_3] : memref<64x256xf32, #tpu.memory_space<vmem>>, vector<32x16xf32>
    tpu.vector_store %arg3[%c0_2, %c0_3], %0 {strides = array<i32>} : memref<64x256xf32, #tpu.memory_space<vmem>>, vector<32x16xf32>,
    %7 = vector.extract_strided_slice %5 {offsets = [0, 0], sizes = [32, 1], strides = [1, 1]} : vector<32x16xf32> to vector<32x1xf32>
    %8 = vector.shape_cast %7 : vector<32x1xf32> to vector<32x1xf32>
    %9 = vector.broadcast %8 : vector<32x1xf32> to vector<32x16xf32>
    %c32 = arith.constant 32 : index
    %c0_4 = arith.constant 0 : index
    %10 = vector.load %arg3[%c32, %c0_4] : memref<64x256xf32, #tpu.memory_space<vmem>>, vector<32x16xf32>
    tpu.vector_store %arg3[%c32, %c0_4], %9 {strides = array<i32>} : memref<64x256xf32, #tpu.memory_space<vmem>>, vector<32x16xf32>,
    %c0_5 = arith.constant 0 : index
    %c16 = arith.constant 16 : index
    %11 = vector.load %arg3[%c0_5, %c16] : memref<64x256xf32, #tpu.memory_space<vmem>>, vector<32x16xf32>
    tpu.vector_store %arg3[%c0_5, %c16], %0 {strides = array<i32>} : memref<64x256xf32, #tpu.memory_space<vmem>>, vector<32x16xf32>,
    %12 = vector.extract_strided_slice %5 {offsets = [0, 1], sizes = [32, 1], strides = [1, 1]} : vector<32x16xf32> to vector<32x1xf32>
    %13 = vector.shape_cast %12 : vector<32x1xf32> to vector<32x1xf32>
    %14 = vector.broadcast %13 : vector<32x1xf32> to vector<32x16xf32>
    %c32_6 = arith.constant 32 : index
    %c16_7 = arith.constant 16 : index
    %15 = vector.load %arg3[%c32_6, %c16_7] : memref<64x256xf32, #tpu.memory_space<vmem>>, vector<32x16xf32>
    tpu.vector_store %arg3[%c32_6, %c16_7], %14 {strides = array<i32>} : memref<64x256xf32, #tpu.memory_space<vmem>>, vector<32x16xf32>,
    %c0_8 = arith.constant 0 : index
    %c32_9 = arith.constant 32 : index
    %16 = vector.load %arg3[%c0_8, %c32_9] : memref<64x256xf32, #tpu.memory_space<vmem>>, vector<32x16xf32>
    tpu.vector_store %arg3[%c0_8, %c32_9], %0 {strides = array<i32>} : memref<64x256xf32, #tpu.memory_space<vmem>>, vector<32x16xf32>,
    %17 = vector.extract_strided_slice %5 {offsets = [0, 2], sizes = [32, 1], strides = [1, 1]} : vector<32x16xf32> to vector<32x1xf32>
    %18 = vector.shape_cast %17 : vector<32x1xf32> to vector<32x1xf32>
    %19 = vector.broadcast %18 : vector<32x1xf32> to vector<32x16xf32>
    %c32_10 = arith.constant 32 : index
    %c32_11 = arith.constant 32 : index
    %20 = vector.load %arg3[%c32_10, %c32_11] : memref<64x256xf32, #tpu.memory_space<vmem>>, vector<32x16xf32>
    tpu.vector_store %arg3[%c32_10, %c32_11], %19 {strides = array<i32>} : memref<64x256xf32, #tpu.memory_space<vmem>>, vector<32x16xf32>,
    %c0_12 = arith.constant 0 : index
    %c48 = arith.constant 48 : index
    %21 = vector.load %arg3[%c0_12, %c48] : memref<64x256xf32, #tpu.memory_space<vmem>>, vector<32x16xf32>
    tpu.vector_store %arg3[%c0_12, %c48], %0 {strides = array<i32>} : memref<64x256xf32, #tpu.memory_space<vmem>>, vector<32x16xf32>,
    %22 = vector.extract_strided_slice %5 {offsets = [0, 3], sizes = [32, 1], strides = [1, 1]} : vector<32x16xf32> to vector<32x1xf32>
    %23 = vector.shape_cast %22 : vector<32x1xf32> to vector<32x1xf32>
    %24 = vector.broadcast %23 : vector<32x1xf32> to vector<32x16xf32>
    %c32_13 = arith.constant 32 : index
    %c48_14 = arith.constant 48 : index
    %25 = vector.load %arg3[%c32_13, %c48_14] : memref<64x256xf32, #tpu.memory_space<vmem>>, vector<32x16xf32>
    tpu.vector_store %arg3[%c32_13, %c48_14], %24 {strides = array<i32>} : memref<64x256xf32, #tpu.memory_space<vmem>>, vector<32x16xf32>,
    %c0_15 = arith.constant 0 : index
    %c64 = arith.constant 64 : index
    %26 = vector.load %arg3[%c0_15, %c64] : memref<64x256xf32, #tpu.memory_space<vmem>>, vector<32x16xf32>
    tpu.vector_store %arg3[%c0_15, %c64], %0 {strides = array<i32>} : memref<64x256xf32, #tpu.memory_space<vmem>>, vector<32x16xf32>,
    %27 = vector.extract_strided_slice %5 {offsets = [0, 4], sizes = [32, 1], strides = [1, 1]} : vector<32x16xf32> to vector<32x1xf32>
    %28 = vector.shape_cast %27 : vector<32x1xf32> to vector<32x1xf32>
    %29 = vector.broadcast %28 : vector<32x1xf32> to vector<32x16xf32>
    %c32_16 = arith.constant 32 : index
    %c64_17 = arith.constant 64 : index
    %30 = vector.load %arg3[%c32_16, %c64_17] : memref<64x256xf32, #tpu.memory_space<vmem>>, vector<32x16xf32>
    tpu.vector_store %arg3[%c32_16, %c64_17], %29 {strides = array<i32>} : memref<64x256xf32, #tpu.memory_space<vmem>>, vector<32x16xf32>,
    %c0_18 = arith.constant 0 : index
    %c80 = arith.constant 80 : index
    %31 = vector.load %arg3[%c0_18, %c80] : memref<64x256xf32, #tpu.memory_space<vmem>>, vector<32x16xf32>
    tpu.vector_store %arg3[%c0_18, %c80], %0 {strides = array<i32>} : memref<64x256xf32, #tpu.memory_space<vmem>>, vector<32x16xf32>,
    %32 = vector.extract_strided_slice %5 {offsets = [0, 5], sizes = [32, 1], strides = [1, 1]} : vector<32x16xf32> to vector<32x1xf32>
    %33 = vector.shape_cast %32 : vector<32x1xf32> to vector<32x1xf32>
    %34 = vector.broadcast %33 : vector<32x1xf32> to vector<32x16xf32>
    %c32_19 = arith.constant 32 : index
    %c80_20 = arith.constant 80 : index
    %35 = vector.load %arg3[%c32_19, %c80_20] : memref<64x256xf32, #tpu.memory_space<vmem>>, vector<32x16xf32>
    tpu.vector_store %arg3[%c32_19, %c80_20], %34 {strides = array<i32>} : memref<64x256xf32, #tpu.memory_space<vmem>>, vector<32x16xf32>,
    %c0_21 = arith.constant 0 : index
    %c96 = arith.constant 96 : index
    %36 = vector.load %arg3[%c0_21, %c96] : memref<64x256xf32, #tpu.memory_space<vmem>>, vector<32x16xf32>
    tpu.vector_store %arg3[%c0_21, %c96], %0 {strides = array<i32>} : memref<64x256xf32, #tpu.memory_space<vmem>>, vector<32x16xf32>,
    %37 = vector.extract_strided_slice %5 {offsets = [0, 6], sizes = [32, 1], strides = [1, 1]} : vector<32x16xf32> to vector<32x1xf32>
    %38 = vector.shape_cast %37 : vector<32x1xf32> to vector<32x1xf32>
    %39 = vector.broadcast %38 : vector<32x1xf32> to vector<32x16xf32>
    %c32_22 = arith.constant 32 : index
    %c96_23 = arith.constant 96 : index
    %40 = vector.load %arg3[%c32_22, %c96_23] : memref<64x256xf32, #tpu.memory_space<vmem>>, vector<32x16xf32>
    tpu.vector_store %arg3[%c32_22, %c96_23], %39 {strides = array<i32>} : memref<64x256xf32, #tpu.memory_space<vmem>>, vector<32x16xf32>,
    %c0_24 = arith.constant 0 : index
    %c112 = arith.constant 112 : index
    %41 = vector.load %arg3[%c0_24, %c112] : memref<64x256xf32, #tpu.memory_space<vmem>>, vector<32x16xf32>
    tpu.vector_store %arg3[%c0_24, %c112], %0 {strides = array<i32>} : memref<64x256xf32, #tpu.memory_space<vmem>>, vector<32x16xf32>,
    %42 = vector.extract_strided_slice %5 {offsets = [0, 7], sizes = [32, 1], strides = [1, 1]} : vector<32x16xf32> to vector<32x1xf32>
    %43 = vector.shape_cast %42 : vector<32x1xf32> to vector<32x1xf32>
    %44 = vector.broadcast %43 : vector<32x1xf32> to vector<32x16xf32>
    %c32_25 = arith.constant 32 : index
    %c112_26 = arith.constant 112 : index
    %45 = vector.load %arg3[%c32_25, %c112_26] : memref<64x256xf32, #tpu.memory_space<vmem>>, vector<32x16xf32>
    tpu.vector_store %arg3[%c32_25, %c112_26], %44 {strides = array<i32>} : memref<64x256xf32, #tpu.memory_space<vmem>>, vector<32x16xf32>,
    %c0_27 = arith.constant 0 : index
    %c128 = arith.constant 128 : index
    %46 = vector.load %arg3[%c0_27, %c128] : memref<64x256xf32, #tpu.memory_space<vmem>>, vector<32x16xf32>
    tpu.vector_store %arg3[%c0_27, %c128], %0 {strides = array<i32>} : memref<64x256xf32, #tpu.memory_space<vmem>>, vector<32x16xf32>,
    %47 = vector.extract_strided_slice %5 {offsets = [0, 8], sizes = [32, 1], strides = [1, 1]} : vector<32x16xf32> to vector<32x1xf32>
    %48 = vector.shape_cast %47 : vector<32x1xf32> to vector<32x1xf32>
    %49 = vector.broadcast %48 : vector<32x1xf32> to vector<32x16xf32>
    %c32_28 = arith.constant 32 : index
    %c128_29 = arith.constant 128 : index
    %50 = vector.load %arg3[%c32_28, %c128_29] : memref<64x256xf32, #tpu.memory_space<vmem>>, vector<32x16xf32>
    tpu.vector_store %arg3[%c32_28, %c128_29], %49 {strides = array<i32>} : memref<64x256xf32, #tpu.memory_space<vmem>>, vector<32x16xf32>,
    %c0_30 = arith.constant 0 : index
    %c144 = arith.constant 144 : index
    %51 = vector.load %arg3[%c0_30, %c144] : memref<64x256xf32, #tpu.memory_space<vmem>>, vector<32x16xf32>
    tpu.vector_store %arg3[%c0_30, %c144], %0 {strides = array<i32>} : memref<64x256xf32, #tpu.memory_space<vmem>>, vector<32x16xf32>,
    %52 = vector.extract_strided_slice %5 {offsets = [0, 9], sizes = [32, 1], strides = [1, 1]} : vector<32x16xf32> to vector<32x1xf32>
    %53 = vector.shape_cast %52 : vector<32x1xf32> to vector<32x1xf32>
    %54 = vector.broadcast %53 : vector<32x1xf32> to vector<32x16xf32>
    %c32_31 = arith.constant 32 : index
    %c144_32 = arith.constant 144 : index
    %55 = vector.load %arg3[%c32_31, %c144_32] : memref<64x256xf32, #tpu.memory_space<vmem>>, vector<32x16xf32>
    tpu.vector_store %arg3[%c32_31, %c144_32], %54 {strides = array<i32>} : memref<64x256xf32, #tpu.memory_space<vmem>>, vector<32x16xf32>,
    %c0_33 = arith.constant 0 : index
    %c160 = arith.constant 160 : index
    %56 = vector.load %arg3[%c0_33, %c160] : memref<64x256xf32, #tpu.memory_space<vmem>>, vector<32x16xf32>
    tpu.vector_store %arg3[%c0_33, %c160], %0 {strides = array<i32>} : memref<64x256xf32, #tpu.memory_space<vmem>>, vector<32x16xf32>,
    %57 = vector.extract_strided_slice %5 {offsets = [0, 10], sizes = [32, 1], strides = [1, 1]} : vector<32x16xf32> to vector<32x1xf32>
    %58 = vector.shape_cast %57 : vector<32x1xf32> to vector<32x1xf32>
    %59 = vector.broadcast %58 : vector<32x1xf32> to vector<32x16xf32>
    %c32_34 = arith.constant 32 : index
    %c160_35 = arith.constant 160 : index
    %60 = vector.load %arg3[%c32_34, %c160_35] : memref<64x256xf32, #tpu.memory_space<vmem>>, vector<32x16xf32>
    tpu.vector_store %arg3[%c32_34, %c160_35], %59 {strides = array<i32>} : memref<64x256xf32, #tpu.memory_space<vmem>>, vector<32x16xf32>,
    %c0_36 = arith.constant 0 : index
    %c176 = arith.constant 176 : index
    %61 = vector.load %arg3[%c0_36, %c176] : memref<64x256xf32, #tpu.memory_space<vmem>>, vector<32x16xf32>
    tpu.vector_store %arg3[%c0_36, %c176], %0 {strides = array<i32>} : memref<64x256xf32, #tpu.memory_space<vmem>>, vector<32x16xf32>,
    %62 = vector.extract_strided_slice %5 {offsets = [0, 11], sizes = [32, 1], strides = [1, 1]} : vector<32x16xf32> to vector<32x1xf32>
    %63 = vector.shape_cast %62 : vector<32x1xf32> to vector<32x1xf32>
    %64 = vector.broadcast %63 : vector<32x1xf32> to vector<32x16xf32>
    %c32_37 = arith.constant 32 : index
    %c176_38 = arith.constant 176 : index
    %65 = vector.load %arg3[%c32_37, %c176_38] : memref<64x256xf32, #tpu.memory_space<vmem>>, vector<32x16xf32>
    tpu.vector_store %arg3[%c32_37, %c176_38], %64 {strides = array<i32>} : memref<64x256xf32, #tpu.memory_space<vmem>>, vector<32x16xf32>,
    %c0_39 = arith.constant 0 : index
    %c192 = arith.constant 192 : index
    %66 = vector.load %arg3[%c0_39, %c192] : memref<64x256xf32, #tpu.memory_space<vmem>>, vector<32x16xf32>
    tpu.vector_store %arg3[%c0_39, %c192], %0 {strides = array<i32>} : memref<64x256xf32, #tpu.memory_space<vmem>>, vector<32x16xf32>,
    %67 = vector.extract_strided_slice %5 {offsets = [0, 12], sizes = [32, 1], strides = [1, 1]} : vector<32x16xf32> to vector<32x1xf32>
    %68 = vector.shape_cast %67 : vector<32x1xf32> to vector<32x1xf32>
    %69 = vector.broadcast %68 : vector<32x1xf32> to vector<32x16xf32>
    %c32_40 = arith.constant 32 : index
    %c192_41 = arith.constant 192 : index
    %70 = vector.load %arg3[%c32_40, %c192_41] : memref<64x256xf32, #tpu.memory_space<vmem>>, vector<32x16xf32>
    tpu.vector_store %arg3[%c32_40, %c192_41], %69 {strides = array<i32>} : memref<64x256xf32, #tpu.memory_space<vmem>>, vector<32x16xf32>,
    %c0_42 = arith.constant 0 : index
    %c208 = arith.constant 208 : index
    %71 = vector.load %arg3[%c0_42, %c208] : memref<64x256xf32, #tpu.memory_space<vmem>>, vector<32x16xf32>
    tpu.vector_store %arg3[%c0_42, %c208], %0 {strides = array<i32>} : memref<64x256xf32, #tpu.memory_space<vmem>>, vector<32x16xf32>,
    %72 = vector.extract_strided_slice %5 {offsets = [0, 13], sizes = [32, 1], strides = [1, 1]} : vector<32x16xf32> to vector<32x1xf32>
    %73 = vector.shape_cast %72 : vector<32x1xf32> to vector<32x1xf32>
    %74 = vector.broadcast %73 : vector<32x1xf32> to vector<32x16xf32>
    %c32_43 = arith.constant 32 : index
    %c208_44 = arith.constant 208 : index
    %75 = vector.load %arg3[%c32_43, %c208_44] : memref<64x256xf32, #tpu.memory_space<vmem>>, vector<32x16xf32>
    tpu.vector_store %arg3[%c32_43, %c208_44], %74 {strides = array<i32>} : memref<64x256xf32, #tpu.memory_space<vmem>>, vector<32x16xf32>,
    %c0_45 = arith.constant 0 : index
    %c224 = arith.constant 224 : index
    %76 = vector.load %arg3[%c0_45, %c224] : memref<64x256xf32, #tpu.memory_space<vmem>>, vector<32x16xf32>
    tpu.vector_store %arg3[%c0_45, %c224], %0 {strides = array<i32>} : memref<64x256xf32, #tpu.memory_space<vmem>>, vector<32x16xf32>,
    %77 = vector.extract_strided_slice %5 {offsets = [0, 14], sizes = [32, 1], strides = [1, 1]} : vector<32x16xf32> to vector<32x1xf32>
    %78 = vector.shape_cast %77 : vector<32x1xf32> to vector<32x1xf32>
    %79 = vector.broadcast %78 : vector<32x1xf32> to vector<32x16xf32>
    %c32_46 = arith.constant 32 : index
    %c224_47 = arith.constant 224 : index
    %80 = vector.load %arg3[%c32_46, %c224_47] : memref<64x256xf32, #tpu.memory_space<vmem>>, vector<32x16xf32>
    tpu.vector_store %arg3[%c32_46, %c224_47], %79 {strides = array<i32>} : memref<64x256xf32, #tpu.memory_space<vmem>>, vector<32x16xf32>,
    %c0_48 = arith.constant 0 : index
    %c240 = arith.constant 240 : index
    %81 = vector.load %arg3[%c0_48, %c240] : memref<64x256xf32, #tpu.memory_space<vmem>>, vector<32x16xf32>
    tpu.vector_store %arg3[%c0_48, %c240], %0 {strides = array<i32>} : memref<64x256xf32, #tpu.memory_space<vmem>>, vector<32x16xf32>,
    %82 = vector.extract_strided_slice %5 {offsets = [0, 15], sizes = [32, 1], strides = [1, 1]} : vector<32x16xf32> to vector<32x1xf32>
    %83 = vector.shape_cast %82 : vector<32x1xf32> to vector<32x1xf32>
    %84 = vector.broadcast %83 : vector<32x1xf32> to vector<32x16xf32>
    %c32_49 = arith.constant 32 : index
    %c240_50 = arith.constant 240 : index
    %85 = vector.load %arg3[%c32_49, %c240_50] : memref<64x256xf32, #tpu.memory_space<vmem>>, vector<32x16xf32>
    tpu.vector_store %arg3[%c32_49, %c240_50], %84 {strides = array<i32>} : memref<64x256xf32, #tpu.memory_space<vmem>>, vector<32x16xf32>,
    return
  }
  func.func @transform_0(%arg0: i32) -> (i32, i32) {
    %c0_i32 = arith.constant 0 : i32
    %c0_i32_0 = arith.constant 0 : i32
    %c0_i32_1 = arith.constant 0 : i32
    return %c0_i32, %c0_i32_0 : i32, i32
  }
  func.func @transform_1(%arg0: i32) -> (i32, i32) {
    %c0_i32 = arith.constant 0 : i32
    %c0_i32_0 = arith.constant 0 : i32
    %c0_i32_1 = arith.constant 0 : i32
    return %c0_i32, %c0_i32_0 : i32, i32
  }
  func.func @transform_2(%arg0: i32) -> (i32, i32) {
    %c0_i32 = arith.constant 0 : i32
    %c0_i32_0 = arith.constant 0 : i32
    return %c0_i32, %arg0 : i32, i32
  }
}

</mosaic_0001>

<bundles_post_ra>
// kernel: tpu_custom_call.1
= control target key start
LH: loop header
LB: loop body
LE: loop exit
PB: predicated region body
PF: predicated region fallthrough
CT: control target
= control target key end

     0   :  { %s642_s13 = smov 16   ;;  %v643_v4 = vmov 0   ;;  %s1005_s0 = inlined_call_operand.vmem [shape: f32[32,16], index: 0, kind: input, shape index: {}]   ;;  %s1006_s1 = inlined_call_operand.vmem [shape: f32[16,32], index: 1, kind: input, shape index: {}]   ;;  %s1007_s2 = inlined_call_operand.hbm [shape: f32[64,256], index: 2, kind: output, shape index: {}]  }
   0x1   :  { %v18_v0 = vld [vmem:[%s1006_s1] sm:$0xff]  ;;  %v19_v2 = vld [vmem:[%s1006_s1 + $0x8] sm:$0xff]  ;;  %578 = vset.pattern.permute.xlu1 %v643_v4 }
   0x2   :  { %v688_v1 = vld [vmem:[%s1005_s0] sm:$0xff]  ;;  %20 = vxpose.xlu0.b32.start [1/2] (short) (narrow) %v18_v0, 32  ;;  %v698_v3 = vld [vmem:[%s1005_s0 + $0x8] sm:$0xff] }
   0x3   :  { %85 = vrot.lane.b32.xlu1 %v688_v1, %s642_s13 }
   0x4   :  { %7 = vsyncpa [#allocation3], 0  ;;  %v706_v5 = vld [vmem:[%s1005_s0 + $0x10] sm:$0xff]  ;;  %v713_v6 = vld [vmem:[%s1005_s0 + $0x18] sm:$0xff]  ;;  %s644_s21 = smov 32   ;;  %s645_s22 = smov 48  }
   0x5   :  { %v646_v7 = vmov 2   ;;  %s647_s0 = smov 64   ;;  %vm52_vm0 = vcmask 130048   ;;  %vm97_vm1 = vcmask 261248   ;;  %vm134_vm2 = vcmask 392448   ;;  %s651_s23 = smov 80  }
   0x6   :  { %21 = vxpose.xlu0.b32.end [2/2] (short) (narrow) %v19_v2, 32  ;;  %53 = vst.msk [vmem:[#allocation2] sm:$0xff] %vm52_vm0, %v688_v1  ;;  %344 = vst.msk [vmem:[#allocation2 + $0x8] sm:$0xff] %vm52_vm0, %v688_v1  ;;  %v648_v15 = vmov 3   ;;  %v649_v16 = vmov 1   ;;  %vm171_vm3 = vcmask 523648  }
   0x7   :  { %87 = vrot.lane.b32.xlu1 %v698_v3, %s642_s13  ;;  %54 = vst.msk [vmem:[#allocation2 + $0x10] sm:$0xff] %vm52_vm0, %v698_v3  ;;  %55 = vst.msk [vmem:[#allocation2 + $0x20] sm:$0xff] %vm52_vm0, %v706_v5  ;;  %v650_v23 = vmov 4   ;;  %v652_v25 = vmov 5   ;;  %s653_s24 = smov 96   ;;  %v654_v28 = vmov 6  }
   0x8   :  { %56 = vst.msk [vmem:[#allocation2 + $0x30] sm:$0xff] %vm52_vm0, %v713_v6  ;;  %345 = vst.msk [vmem:[#allocation2 + $0x18] sm:$0xff] %vm52_vm0, %v698_v3  ;;  %vm208_vm4 = vcmask 654848   ;;  %s655_s25 = smov 112   ;;  %v656_v30 = vmov 7   ;;  %v657_v31 = vmov 8  }
   0x9   :  { %346 = vst.msk [vmem:[#allocation2 + $0x28] sm:$0xff] %vm52_vm0, %v706_v5  ;;  %347 = vst.msk [vmem:[#allocation2 + $0x38] sm:$0xff] %vm52_vm0, %v713_v6  ;;  %v658_v32 = vmov 9   ;;  %v659_v33 = vmov 10   ;;  %v660_v34 = vmov 11   ;;  %v661_v35 = vmov 12  }
   0xa   :  { %v662_v36 = vmov 13   ;;  %v663_v37 = vmov 14   ;;  %v664_v38 = vmov 15   ;;  %vm245_vm5 = vcmask 786048   ;;  %s665_s26 = smov [#allocation2]  }
   0xb   :  { %89 = vrot.lane.b32.xlu1 %v706_v5, %s642_s13  ;;  %vm282_vm6 = vcmask 917248   ;;  %vm319_vm7 = vcmask 1048448   ;;  %s541_s27 = sshll.u32 %s665_s26, 4  ;;  %s542_s27 = int_to_ptr.vmem [resolvable:$true] %s541_s27 }
   0xc   :  { %s618_s28 = scalar_lea.vmem %s542_s27, 2048  ;;  %p623_p1 = scmp.lt.s32.totalorder %s542_s27, %s542_s27 }
   0xd   :  { %p619_p0 = scmp.ne.s32.totalorder %s542_s27, %s618_s28  ;;  %p624_p2 = scmp.lt.s32.totalorder %s618_s28, %s618_s28 }
   0xf   :  { %91 = vrot.lane.b32.xlu1 %v713_v6, %s642_s13  ;;  %p625_p3 = por %p624_p2, %p623_p1 }
  0x11   :  { %p626_p4 = pnand %p625_p3, %p619_p0 }
  0x13   :  { %122 = vrot.lane.b32.xlu1 %v688_v1, %s644_s21 }
  0x17   :  { %124 = vrot.lane.b32.xlu1 %v698_v3, %s644_s21 }
  0x1b   :  { %126 = vrot.lane.b32.xlu1 %v706_v5, %s644_s21 }
  0x1f   :  { %128 = vrot.lane.b32.xlu1 %v713_v6, %s644_s21 }
  0x23   :  { %159 = vrot.lane.b32.xlu1 %v688_v1, %s645_s22 }
  0x27   :  { %163 = vrot.lane.b32.xlu1 %v706_v5, %s645_s22 }
  0x2f   :  { %580 = vset.pattern.permute.xlu0 %v646_v7 }
  0x37   :  { %161 = vrot.lane.b32.xlu0 %v698_v3, %s645_s22 }
  0x3b   :  { %165 = vrot.lane.b32.xlu0 %v713_v6, %s645_s22 }
  0x3f   :  { %196 = vrot.lane.b32.xlu0 %v688_v1, %s647_s0 }
  0x75   :  { %v86_v8 = vpop.permute.xlu1 %85 }
  0x76   :  { %98 = vst.msk [vmem:[#allocation2] sm:$0xff] %vm97_vm1, %v86_v8  ;;  %368 = vst.msk [vmem:[#allocation2 + $0x8] sm:$0xff] %vm97_vm1, %v86_v8 }
  0x79   :  { %v88_v9 = vpop.permute.xlu1 %87 }
  0x7a   :  { %99 = vst.msk [vmem:[#allocation2 + $0x10] sm:$0xff] %vm97_vm1, %v88_v9  ;;  %369 = vst.msk [vmem:[#allocation2 + $0x18] sm:$0xff] %vm97_vm1, %v88_v9 }
  0x7d   :  { %v90_v10 = vpop.permute.xlu1 %89 }
  0x7e   :  { %100 = vst.msk [vmem:[#allocation2 + $0x20] sm:$0xff] %vm97_vm1, %v90_v10  ;;  %370 = vst.msk [vmem:[#allocation2 + $0x28] sm:$0xff] %vm97_vm1, %v90_v10 }
  0x81   :  { %v92_v11 = vpop.permute.xlu1 %91 }
  0x82   :  { %101 = vst.msk [vmem:[#allocation2 + $0x30] sm:$0xff] %vm97_vm1, %v92_v11  ;;  %371 = vst.msk [vmem:[#allocation2 + $0x38] sm:$0xff] %vm97_vm1, %v92_v11  ;;  %v752_v12 = vpop.trf.xlu0 }
  0x83   :  { %140 = vperm.xlu0 %580, %v752_v12   ;;  %59 = vperm.xlu1 %578, %v752_v12  }
  0x85   :  { %v123_v13 = vpop.permute.xlu1 %122 }
  0x86   :  { %135 = vst.msk [vmem:[#allocation2] sm:$0xff] %vm134_vm2, %v123_v13  ;;  %392 = vst.msk [vmem:[#allocation2 + $0x8] sm:$0xff] %vm134_vm2, %v123_v13  ;;  %v758_v14 = vpop.trf.xlu0 }
  0x87   :  { %585 = vset.pattern.permute.xlu0 %v648_v15  ;;  %579 = vset.pattern.permute.xlu1 %v649_v16 }
  0x88   :  { %181 = vperm.xlu0 %585, %v758_v14   ;;  %103 = vperm.xlu1 %579, %v752_v12  }
  0x89   :  { %v125_v17 = vpop.permute.xlu1 %124 }
  0x8a   :  { %136 = vst.msk [vmem:[#allocation2 + $0x10] sm:$0xff] %vm134_vm2, %v125_v17  ;;  %393 = vst.msk [vmem:[#allocation2 + $0x18] sm:$0xff] %vm134_vm2, %v125_v17  ;;  %v766_v18 = vpop.trf.xlu0 }
  0x8c   :  { %586 = vset.pattern.permute.xlu0 %v643_v4  ;;  %581 = vset.pattern.permute.xlu1 %v648_v15 }
  0x8d   :  { %v127_v19 = vpop.permute.xlu1 %126  ;;  %69 = vperm.xlu0 %586, %v766_v18   ;;  %177 = vperm.xlu1 %581, %v752_v12  }
  0x8e   :  { %137 = vst.msk [vmem:[#allocation2 + $0x20] sm:$0xff] %vm134_vm2, %v127_v19  ;;  %394 = vst.msk [vmem:[#allocation2 + $0x28] sm:$0xff] %vm134_vm2, %v127_v19  ;;  %v774_v20 = vpop.trf.xlu0 }
  0x91   :  { %v129_v21 = vpop.permute.xlu1 %128  ;;  %592 = vset.pattern.permute.xlu0 %v646_v7  ;;  %582 = vset.pattern.permute.xlu1 %v643_v4 }
  0x92   :  { %138 = vst.msk [vmem:[#allocation2 + $0x30] sm:$0xff] %vm134_vm2, %v129_v21  ;;  %395 = vst.msk [vmem:[#allocation2 + $0x38] sm:$0xff] %vm134_vm2, %v129_v21  ;;  %152 = vperm.xlu0 %592, %v774_v20   ;;  %64 = vperm.xlu1 %582, %v758_v14  }
  0x95   :  { %v160_v22 = vpop.permute.xlu1 %159 }
  0x96   :  { %172 = vst.msk [vmem:[#allocation2] sm:$0xff] %vm171_vm3, %v160_v22  ;;  %416 = vst.msk [vmem:[#allocation2 + $0x8] sm:$0xff] %vm171_vm3, %v160_v22  ;;  %200 = vrot.lane.b32.xlu0 %v706_v5, %s647_s0  ;;  %583 = vset.pattern.permute.xlu1 %v649_v16 }
  0x97   :  { %107 = vperm.xlu1 %583, %v758_v14   ;;  %594 = vset.pattern.permute.xlu0 %v650_v23 }
  0x99   :  { %v164_v24 = vpop.permute.xlu1 %163 }
  0x9a   :  { %174 = vst.msk [vmem:[#allocation2 + $0x20] sm:$0xff] %vm171_vm3, %v164_v24  ;;  %418 = vst.msk [vmem:[#allocation2 + $0x28] sm:$0xff] %vm171_vm3, %v164_v24  ;;  %214 = vperm.xlu0 %594, %v752_v12  }
  0x9b   :  { %584 = vset.pattern.permute.xlu1 %v646_v7 }
  0x9c   :  { %144 = vperm.xlu1 %584, %v758_v14  }
  0x9e   :  { %226 = vperm.xlu0 %594, %v774_v20  }
  0xa0   :  { %587 = vset.pattern.permute.xlu1 %v649_v16 }
  0xa1   :  { %111 = vperm.xlu1 %587, %v766_v18  }
  0xa2   :  { %235 = vrot.lane.b32.xlu0 %v698_v3, %s651_s23 }
  0xa3   :  { %597 = vset.pattern.permute.xlu0 %v652_v25 }
  0xa5   :  { %588 = vset.pattern.permute.xlu1 %v646_v7 }
  0xa6   :  { %239 = vrot.lane.b32.xlu0 %v713_v6, %s651_s23  ;;  %148 = vperm.xlu1 %588, %v766_v18  }
  0xa9   :  { %v162_v26 = vpop.permute.xlu0 %161 }
  0xaa   :  { %255 = vperm.xlu0 %597, %v758_v14   ;;  %589 = vset.pattern.permute.xlu1 %v648_v15  ;;  %173 = vst.msk [vmem:[#allocation2 + $0x10] sm:$0xff] %vm171_vm3, %v162_v26  ;;  %417 = vst.msk [vmem:[#allocation2 + $0x18] sm:$0xff] %vm171_vm3, %v162_v26 }
  0xab   :  { %185 = vperm.xlu1 %589, %v766_v18  }
  0xad   :  { %v166_v27 = vpop.permute.xlu0 %165 }
  0xae   :  { %270 = vrot.lane.b32.xlu0 %v688_v1, %s653_s24  ;;  %175 = vst.msk [vmem:[#allocation2 + $0x30] sm:$0xff] %vm171_vm3, %v166_v27  ;;  %419 = vst.msk [vmem:[#allocation2 + $0x38] sm:$0xff] %vm171_vm3, %v166_v27 }
  0xaf   :  { %590 = vset.pattern.permute.xlu1 %v643_v4  ;;  %598 = vset.pattern.permute.xlu0 %v654_v28 }
  0xb0   :  { %74 = vperm.xlu1 %590, %v774_v20  }
  0xb1   :  { %v197_v29 = vpop.permute.xlu0 %196 }
  0xb2   :  { %274 = vrot.lane.b32.xlu0 %v706_v5, %s653_s24  ;;  %209 = vst.msk [vmem:[#allocation2] sm:$0xff] %vm208_vm4, %v197_v29  ;;  %440 = vst.msk [vmem:[#allocation2 + $0x8] sm:$0xff] %vm208_vm4, %v197_v29 }
  0xb4   :  { %591 = vset.pattern.permute.xlu1 %v649_v16 }
  0xb5   :  { %115 = vperm.xlu1 %591, %v774_v20  }
  0xb6   :  { %288 = vperm.xlu0 %598, %v752_v12  }
  0xb9   :  { %593 = vset.pattern.permute.xlu1 %v648_v15 }
  0xba   :  { %300 = vperm.xlu0 %598, %v774_v20   ;;  %189 = vperm.xlu1 %593, %v774_v20  }
  0xbe   :  { %309 = vrot.lane.b32.xlu0 %v698_v3, %s655_s25  ;;  %198 = vrot.lane.b32.xlu1 %v698_v3, %s647_s0 }
  0xbf   :  { %601 = vset.pattern.permute.xlu0 %v656_v30  ;;  %595 = vset.pattern.permute.xlu1 %v650_v23 }
  0xc2   :  { %313 = vrot.lane.b32.xlu0 %v713_v6, %s655_s25  ;;  %202 = vrot.lane.b32.xlu1 %v713_v6, %s647_s0 }
  0xc6   :  { %329 = vperm.xlu0 %601, %v758_v14   ;;  %218 = vperm.xlu1 %595, %v758_v14  }
  0xca   :  { %602 = vset.pattern.permute.xlu0 %v657_v31  ;;  %222 = vperm.xlu1 %595, %v766_v18  }
  0xcb   :  { %349 = vperm.xlu0 %602, %v752_v12  }
  0xce   :  { %233 = vrot.lane.b32.xlu1 %v688_v1, %s651_s23 }
  0xcf   :  { %361 = vperm.xlu0 %602, %v774_v20   ;;  %596 = vset.pattern.permute.xlu1 %v652_v25 }
  0xd2   :  { %237 = vrot.lane.b32.xlu1 %v706_v5, %s651_s23 }
  0xd3   :  { %605 = vset.pattern.permute.xlu0 %v658_v32 }
  0xd4   :  { %377 = vperm.xlu0 %605, %v758_v14  }
  0xd6   :  { %251 = vperm.xlu1 %596, %v752_v12  }
  0xd8   :  { %606 = vset.pattern.permute.xlu0 %v659_v33 }
  0xd9   :  { %397 = vperm.xlu0 %606, %v752_v12  }
  0xda   :  { %259 = vperm.xlu1 %596, %v766_v18  }
  0xdd   :  { %409 = vperm.xlu0 %606, %v774_v20  }
  0xde   :  { %263 = vperm.xlu1 %596, %v774_v20  }
  0xe1   :  { %609 = vset.pattern.permute.xlu0 %v660_v34 }
  0xe2   :  { %425 = vperm.xlu0 %609, %v758_v14   ;;  %272 = vrot.lane.b32.xlu1 %v698_v3, %s653_s24 }
  0xe3   :  { %599 = vset.pattern.permute.xlu1 %v654_v28 }
  0xe6   :  { %610 = vset.pattern.permute.xlu0 %v661_v35  ;;  %276 = vrot.lane.b32.xlu1 %v713_v6, %s653_s24 }
  0xe7   :  { %445 = vperm.xlu0 %610, %v752_v12  }
  0xea   :  { %292 = vperm.xlu1 %599, %v758_v14  }
  0xeb   :  { %457 = vperm.xlu0 %610, %v774_v20  }
  0xee   :  { %296 = vperm.xlu1 %599, %v766_v18  }
  0xef   :  { %613 = vset.pattern.permute.xlu0 %v662_v36 }
  0xf0   :  { %473 = vperm.xlu0 %613, %v758_v14  }
  0xf2   :  { %307 = vrot.lane.b32.xlu1 %v688_v1, %s655_s25 }
  0xf3   :  { %600 = vset.pattern.permute.xlu1 %v656_v30 }
  0xf4   :  { %614 = vset.pattern.permute.xlu0 %v663_v37 }
  0xf5   :  { %493 = vperm.xlu0 %614, %v752_v12  }
  0xf6   :  { %311 = vrot.lane.b32.xlu1 %v706_v5, %s655_s25 }
  0xf9   :  { %505 = vperm.xlu0 %614, %v774_v20  }
  0xfa   :  { %325 = vperm.xlu1 %600, %v752_v12  }
  0xfd   :  { %617 = vset.pattern.permute.xlu0 %v664_v38 }
  0xfe   :  { %521 = vperm.xlu0 %617, %v758_v14   ;;  %333 = vperm.xlu1 %600, %v766_v18  }
 0x102   :  { %337 = vperm.xlu1 %600, %v774_v20   ;;  %v60_v39 = vpop.permute.xlu1 %59  ;;  %v141_v40 = vpop.permute.xlu0 %140 }
 0x103   :  { %77 = vst.msk [vmem:[#allocation2 + $0x40] sm:$0xff] %vm52_vm0, %v60_v39 }
 0x106   :  { %603 = vset.pattern.permute.xlu1 %v657_v31 }
 0x107   :  { %353 = vperm.xlu1 %603, %v758_v14   ;;  %v104_v41 = vpop.permute.xlu1 %103  ;;  %v182_v42 = vpop.permute.xlu0 %181 }
 0x108   :  { %118 = vst.msk [vmem:[#allocation2 + $0x40] sm:$0xff] %vm97_vm1, %v104_v41 }
 0x109   :  { %155 = vst.msk [vmem:[#allocation2 + $0x40] sm:$0xff] %vm134_vm2, %v141_v40 }
 0x10b   :  { %357 = vperm.xlu1 %603, %v766_v18  }
 0x10c   :  { %v178_v43 = vpop.permute.xlu1 %177  ;;  %v70_v44 = vpop.permute.xlu0 %69 }
 0x10d   :  { %192 = vst.msk [vmem:[#allocation2 + $0x40] sm:$0xff] %vm171_vm3, %v178_v43 }
 0x10e   :  { %79 = vst.msk [vmem:[#allocation2 + $0x60] sm:$0xff] %vm52_vm0, %v70_v44 }
 0x10f   :  { %604 = vset.pattern.permute.xlu1 %v658_v32 }
 0x110   :  { %373 = vperm.xlu1 %604, %v752_v12  }
 0x111   :  { %v153_v45 = vpop.permute.xlu0 %152  ;;  %v65_v46 = vpop.permute.xlu1 %64 }
 0x112   :  { %78 = vst.msk [vmem:[#allocation2 + $0x50] sm:$0xff] %vm52_vm0, %v65_v46 }
 0x114   :  { %381 = vperm.xlu1 %604, %v766_v18  }
 0x115   :  { %v201_v47 = vpop.permute.xlu0 %200 }
 0x116   :  { %211 = vst.msk [vmem:[#allocation2 + $0x20] sm:$0xff] %vm208_vm4, %v201_v47  ;;  %442 = vst.msk [vmem:[#allocation2 + $0x28] sm:$0xff] %vm208_vm4, %v201_v47  ;;  %v108_v48 = vpop.permute.xlu1 %107 }
 0x117   :  { %119 = vst.msk [vmem:[#allocation2 + $0x50] sm:$0xff] %vm97_vm1, %v108_v48 }
 0x118   :  { %385 = vperm.xlu1 %604, %v774_v20  }
 0x119   :  { %v215_v49 = vpop.permute.xlu0 %214 }
 0x11a   :  { %229 = vst.msk [vmem:[#allocation2 + $0x40] sm:$0xff] %vm208_vm4, %v215_v49 }
 0x11b   :  { %v145_v50 = vpop.permute.xlu1 %144 }
 0x11c   :  { %156 = vst.msk [vmem:[#allocation2 + $0x50] sm:$0xff] %vm134_vm2, %v145_v50  ;;  %607 = vset.pattern.permute.xlu1 %v659_v33 }
 0x11d   :  { %193 = vst.msk [vmem:[#allocation2 + $0x50] sm:$0xff] %vm171_vm3, %v182_v42  ;;  %v227_v51 = vpop.permute.xlu0 %226  ;;  %401 = vperm.xlu1 %607, %v758_v14  }
 0x120   :  { %v112_v52 = vpop.permute.xlu1 %111 }
 0x121   :  { %120 = vst.msk [vmem:[#allocation2 + $0x60] sm:$0xff] %vm97_vm1, %v112_v52  ;;  %v236_v53 = vpop.permute.xlu0 %235  ;;  %405 = vperm.xlu1 %607, %v766_v18  }
 0x125   :  { %v240_v54 = vpop.permute.xlu0 %239  ;;  %608 = vset.pattern.permute.xlu1 %v660_v34  ;;  %v149_v55 = vpop.permute.xlu1 %148 }
 0x126   :  { %157 = vst.msk [vmem:[#allocation2 + $0x60] sm:$0xff] %vm134_vm2, %v149_v55  ;;  %421 = vperm.xlu1 %608, %v752_v12  }
 0x129   :  { %v256_v56 = vpop.permute.xlu0 %255 }
 0x12a   :  { %429 = vperm.xlu1 %608, %v766_v18   ;;  %v186_v57 = vpop.permute.xlu1 %185 }
 0x12b   :  { %194 = vst.msk [vmem:[#allocation2 + $0x60] sm:$0xff] %vm171_vm3, %v186_v57 }
 0x12d   :  { %v271_v58 = vpop.permute.xlu0 %270 }
 0x12e   :  { %433 = vperm.xlu1 %608, %v774_v20  }
 0x12f   :  { %v75_v59 = vpop.permute.xlu1 %74 }
 0x130   :  { %80 = vst.msk [vmem:[#allocation2 + $0x70] sm:$0xff] %vm52_vm0, %v75_v59 }
 0x131   :  { %v275_v60 = vpop.permute.xlu0 %274 }
 0x132   :  { %611 = vset.pattern.permute.xlu1 %v661_v35 }
 0x133   :  { %449 = vperm.xlu1 %611, %v758_v14  }
 0x134   :  { %v116_v61 = vpop.permute.xlu1 %115 }
 0x135   :  { %121 = vst.msk [vmem:[#allocation2 + $0x70] sm:$0xff] %vm97_vm1, %v116_v61  ;;  %v289_v62 = vpop.permute.xlu0 %288 }
 0x136   :  { %158 = vst.msk [vmem:[#allocation2 + $0x70] sm:$0xff] %vm134_vm2, %v153_v45 }
 0x137   :  { %453 = vperm.xlu1 %611, %v766_v18  }
 0x139   :  { %v301_v63 = vpop.permute.xlu0 %300  ;;  %v190_v0 = vpop.permute.xlu1 %189 }
 0x13a   :  { %195 = vst.msk [vmem:[#allocation2 + $0x70] sm:$0xff] %vm171_vm3, %v190_v0 }
 0x13b   :  { %232 = vst.msk [vmem:[#allocation2 + $0x70] sm:$0xff] %vm208_vm4, %v227_v51  ;;  %612 = vset.pattern.permute.xlu1 %v662_v36 }
 0x13c   :  { %469 = vperm.xlu1 %612, %v752_v12  }
 0x13d   :  { %v310_v1 = vpop.permute.xlu0 %309  ;;  %v199_v2 = vpop.permute.xlu1 %198 }
 0x13e   :  { %210 = vst.msk [vmem:[#allocation2 + $0x10] sm:$0xff] %vm208_vm4, %v199_v2  ;;  %441 = vst.msk [vmem:[#allocation2 + $0x18] sm:$0xff] %vm208_vm4, %v199_v2 }
 0x13f   :  { %247 = vst.msk [vmem:[#allocation2 + $0x10] sm:$0xff] %vm245_vm5, %v236_v53  ;;  %465 = vst.msk [vmem:[#allocation2 + $0x18] sm:$0xff] %vm245_vm5, %v236_v53 }
 0x140   :  { %477 = vperm.xlu1 %612, %v766_v18  }
 0x141   :  { %v314_v3 = vpop.permute.xlu0 %313  ;;  %v203_v4 = vpop.permute.xlu1 %202 }
 0x142   :  { %212 = vst.msk [vmem:[#allocation2 + $0x30] sm:$0xff] %vm208_vm4, %v203_v4  ;;  %443 = vst.msk [vmem:[#allocation2 + $0x38] sm:$0xff] %vm208_vm4, %v203_v4 }
 0x143   :  { %249 = vst.msk [vmem:[#allocation2 + $0x30] sm:$0xff] %vm245_vm5, %v240_v54  ;;  %467 = vst.msk [vmem:[#allocation2 + $0x38] sm:$0xff] %vm245_vm5, %v240_v54 }
 0x144   :  { %481 = vperm.xlu1 %612, %v774_v20  }
 0x145   :  { %v330_v5 = vpop.permute.xlu0 %329  ;;  %v219_v6 = vpop.permute.xlu1 %218 }
 0x146   :  { %230 = vst.msk [vmem:[#allocation2 + $0x50] sm:$0xff] %vm208_vm4, %v219_v6 }
 0x147   :  { %267 = vst.msk [vmem:[#allocation2 + $0x50] sm:$0xff] %vm245_vm5, %v256_v56 }
 0x148   :  { %615 = vset.pattern.permute.xlu1 %v663_v37 }
 0x149   :  { %497 = vperm.xlu1 %615, %v758_v14   ;;  %v223_v7 = vpop.permute.xlu1 %222 }
 0x14a   :  { %231 = vst.msk [vmem:[#allocation2 + $0x60] sm:$0xff] %vm208_vm4, %v223_v7  ;;  %v350_v8 = vpop.permute.xlu0 %349 }
 0x14b   :  { %364 = vst.msk [vmem:[#allocation2 + $0x48] sm:$0xff] %vm52_vm0, %v350_v8 }
 0x14d   :  { %501 = vperm.xlu1 %615, %v766_v18   ;;  %v234_v9 = vpop.permute.xlu1 %233 }
 0x14e   :  { %246 = vst.msk [vmem:[#allocation2] sm:$0xff] %vm245_vm5, %v234_v9  ;;  %464 = vst.msk [vmem:[#allocation2 + $0x8] sm:$0xff] %vm245_vm5, %v234_v9  ;;  %v362_v10 = vpop.permute.xlu0 %361 }
 0x14f   :  { %367 = vst.msk [vmem:[#allocation2 + $0x78] sm:$0xff] %vm52_vm0, %v362_v10 }
 0x150   :  { %283 = vst.msk [vmem:[#allocation2] sm:$0xff] %vm282_vm6, %v271_v58  ;;  %488 = vst.msk [vmem:[#allocation2 + $0x8] sm:$0xff] %vm282_vm6, %v271_v58 }
 0x151   :  { %616 = vset.pattern.permute.xlu1 %v664_v38  ;;  %v238_v11 = vpop.permute.xlu1 %237 }
 0x152   :  { %248 = vst.msk [vmem:[#allocation2 + $0x20] sm:$0xff] %vm245_vm5, %v238_v11  ;;  %466 = vst.msk [vmem:[#allocation2 + $0x28] sm:$0xff] %vm245_vm5, %v238_v11  ;;  %517 = vperm.xlu1 %616, %v752_v12  }
 0x153   :  { %285 = vst.msk [vmem:[#allocation2 + $0x20] sm:$0xff] %vm282_vm6, %v275_v60  ;;  %490 = vst.msk [vmem:[#allocation2 + $0x28] sm:$0xff] %vm282_vm6, %v275_v60  ;;  %v378_v25 = vpop.permute.xlu0 %377 }
 0x155   :  { %v252_v13 = vpop.permute.xlu1 %251 }
 0x156   :  { %266 = vst.msk [vmem:[#allocation2 + $0x40] sm:$0xff] %vm245_vm5, %v252_v13  ;;  %525 = vperm.xlu1 %616, %v766_v18  }
 0x157   :  { %303 = vst.msk [vmem:[#allocation2 + $0x40] sm:$0xff] %vm282_vm6, %v289_v62 }
 0x158   :  { %v398_v28 = vpop.permute.xlu0 %397 }
 0x159   :  { %v260_v14 = vpop.permute.xlu1 %259 }
 0x15a   :  { %268 = vst.msk [vmem:[#allocation2 + $0x60] sm:$0xff] %vm245_vm5, %v260_v14  ;;  %529 = vperm.xlu1 %616, %v774_v20  }
 0x15c   :  { %v410_v30 = vpop.permute.xlu0 %409 }
 0x15d   :  { %v264_v15 = vpop.permute.xlu1 %263 }
 0x15e   :  { %269 = vst.msk [vmem:[#allocation2 + $0x70] sm:$0xff] %vm245_vm5, %v264_v15 }
 0x15f   :  { %306 = vst.msk [vmem:[#allocation2 + $0x70] sm:$0xff] %vm282_vm6, %v301_v63 }
 0x161   :  { %v273_v12 = vpop.permute.xlu1 %272  ;;  %v426_v33 = vpop.permute.xlu0 %425 }
 0x162   :  { %284 = vst.msk [vmem:[#allocation2 + $0x10] sm:$0xff] %vm282_vm6, %v273_v12  ;;  %489 = vst.msk [vmem:[#allocation2 + $0x18] sm:$0xff] %vm282_vm6, %v273_v12 }
 0x163   :  { %321 = vst.msk [vmem:[#allocation2 + $0x10] sm:$0xff] %vm319_vm7, %v310_v1  ;;  %513 = vst.msk [vmem:[#allocation2 + $0x18] sm:$0xff] %vm319_vm7, %v310_v1 }
 0x165   :  { %v277_v16 = vpop.permute.xlu1 %276 }
 0x166   :  { %286 = vst.msk [vmem:[#allocation2 + $0x30] sm:$0xff] %vm282_vm6, %v277_v16  ;;  %491 = vst.msk [vmem:[#allocation2 + $0x38] sm:$0xff] %vm282_vm6, %v277_v16  ;;  %v446_v36 = vpop.permute.xlu0 %445 }
 0x167   :  { %323 = vst.msk [vmem:[#allocation2 + $0x30] sm:$0xff] %vm319_vm7, %v314_v3  ;;  %515 = vst.msk [vmem:[#allocation2 + $0x38] sm:$0xff] %vm319_vm7, %v314_v3 }
 0x169   :  { %v293_v17 = vpop.permute.xlu1 %292 }
 0x16a   :  { %304 = vst.msk [vmem:[#allocation2 + $0x50] sm:$0xff] %vm282_vm6, %v293_v17  ;;  %v458_v38 = vpop.permute.xlu0 %457 }
 0x16b   :  { %341 = vst.msk [vmem:[#allocation2 + $0x50] sm:$0xff] %vm319_vm7, %v330_v5 }
 0x16d   :  { %v297_v18 = vpop.permute.xlu1 %296 }
 0x16e   :  { %305 = vst.msk [vmem:[#allocation2 + $0x60] sm:$0xff] %vm282_vm6, %v297_v18 }
 0x16f   :  { %v474_v41 = vpop.permute.xlu0 %473 }
 0x171   :  { %v308_v19 = vpop.permute.xlu1 %307 }
 0x172   :  { %320 = vst.msk [vmem:[#allocation2] sm:$0xff] %vm319_vm7, %v308_v19  ;;  %512 = vst.msk [vmem:[#allocation2 + $0x8] sm:$0xff] %vm319_vm7, %v308_v19 }
 0x174   :  { %v494_v44 = vpop.permute.xlu0 %493 }
 0x175   :  { %v312_v20 = vpop.permute.xlu1 %311 }
 0x176   :  { %322 = vst.msk [vmem:[#allocation2 + $0x20] sm:$0xff] %vm319_vm7, %v312_v20  ;;  %514 = vst.msk [vmem:[#allocation2 + $0x28] sm:$0xff] %vm319_vm7, %v312_v20 }
 0x178   :  { %v506_v46 = vpop.permute.xlu0 %505 }
 0x179   :  { %v326_v21 = vpop.permute.xlu1 %325 }
 0x17a   :  { %340 = vst.msk [vmem:[#allocation2 + $0x40] sm:$0xff] %vm319_vm7, %v326_v21 }
 0x17d   :  { %v334_v22 = vpop.permute.xlu1 %333  ;;  %v522_v49 = vpop.permute.xlu0 %521 }
 0x17e   :  { %342 = vst.msk [vmem:[#allocation2 + $0x60] sm:$0xff] %vm319_vm7, %v334_v22 }
 0x181   :  { %v338_v23 = vpop.permute.xlu1 %337 }
 0x182   :  { %343 = vst.msk [vmem:[#allocation2 + $0x70] sm:$0xff] %vm319_vm7, %v338_v23 }
 0x186   :  { %v354_v24 = vpop.permute.xlu1 %353 }
 0x187   :  { %365 = vst.msk [vmem:[#allocation2 + $0x58] sm:$0xff] %vm52_vm0, %v354_v24 }
 0x188   :  { %389 = vst.msk [vmem:[#allocation2 + $0x58] sm:$0xff] %vm97_vm1, %v378_v25 }
 0x18a   :  { %v358_v26 = vpop.permute.xlu1 %357 }
 0x18b   :  { %366 = vst.msk [vmem:[#allocation2 + $0x68] sm:$0xff] %vm52_vm0, %v358_v26 }
 0x18f   :  { %v374_v27 = vpop.permute.xlu1 %373 }
 0x190   :  { %388 = vst.msk [vmem:[#allocation2 + $0x48] sm:$0xff] %vm97_vm1, %v374_v27 }
 0x191   :  { %412 = vst.msk [vmem:[#allocation2 + $0x48] sm:$0xff] %vm134_vm2, %v398_v28 }
 0x193   :  { %v382_v29 = vpop.permute.xlu1 %381 }
 0x194   :  { %390 = vst.msk [vmem:[#allocation2 + $0x68] sm:$0xff] %vm97_vm1, %v382_v29 }
 0x197   :  { %v386_v31 = vpop.permute.xlu1 %385 }
 0x198   :  { %391 = vst.msk [vmem:[#allocation2 + $0x78] sm:$0xff] %vm97_vm1, %v386_v31 }
 0x199   :  { %415 = vst.msk [vmem:[#allocation2 + $0x78] sm:$0xff] %vm134_vm2, %v410_v30 }
 0x19c   :  { %v402_v32 = vpop.permute.xlu1 %401 }
 0x19d   :  { %413 = vst.msk [vmem:[#allocation2 + $0x58] sm:$0xff] %vm134_vm2, %v402_v32 }
 0x19e   :  { %437 = vst.msk [vmem:[#allocation2 + $0x58] sm:$0xff] %vm171_vm3, %v426_v33 }
 0x1a0   :  { %v406_v34 = vpop.permute.xlu1 %405 }
 0x1a1   :  { %414 = vst.msk [vmem:[#allocation2 + $0x68] sm:$0xff] %vm134_vm2, %v406_v34 }
 0x1a5   :  { %v422_v35 = vpop.permute.xlu1 %421 }
 0x1a6   :  { %436 = vst.msk [vmem:[#allocation2 + $0x48] sm:$0xff] %vm171_vm3, %v422_v35 }
 0x1a7   :  { %460 = vst.msk [vmem:[#allocation2 + $0x48] sm:$0xff] %vm208_vm4, %v446_v36 }
 0x1a9   :  { %v430_v37 = vpop.permute.xlu1 %429 }
 0x1aa   :  { %438 = vst.msk [vmem:[#allocation2 + $0x68] sm:$0xff] %vm171_vm3, %v430_v37 }
 0x1ad   :  { %v434_v39 = vpop.permute.xlu1 %433 }
 0x1ae   :  { %439 = vst.msk [vmem:[#allocation2 + $0x78] sm:$0xff] %vm171_vm3, %v434_v39 }
 0x1af   :  { %463 = vst.msk [vmem:[#allocation2 + $0x78] sm:$0xff] %vm208_vm4, %v458_v38 }
 0x1b2   :  { %v450_v40 = vpop.permute.xlu1 %449 }
 0x1b3   :  { %461 = vst.msk [vmem:[#allocation2 + $0x58] sm:$0xff] %vm208_vm4, %v450_v40 }
 0x1b4   :  { %485 = vst.msk [vmem:[#allocation2 + $0x58] sm:$0xff] %vm245_vm5, %v474_v41 }
 0x1b6   :  { %v454_v42 = vpop.permute.xlu1 %453 }
 0x1b7   :  { %462 = vst.msk [vmem:[#allocation2 + $0x68] sm:$0xff] %vm208_vm4, %v454_v42 }
 0x1bb   :  { %v470_v43 = vpop.permute.xlu1 %469 }
 0x1bc   :  { %484 = vst.msk [vmem:[#allocation2 + $0x48] sm:$0xff] %vm245_vm5, %v470_v43 }
 0x1bd   :  { %508 = vst.msk [vmem:[#allocation2 + $0x48] sm:$0xff] %vm282_vm6, %v494_v44 }
 0x1bf   :  { %v478_v45 = vpop.permute.xlu1 %477 }
 0x1c0   :  { %486 = vst.msk [vmem:[#allocation2 + $0x68] sm:$0xff] %vm245_vm5, %v478_v45 }
 0x1c3   :  { %v482_v47 = vpop.permute.xlu1 %481 }
 0x1c4   :  { %487 = vst.msk [vmem:[#allocation2 + $0x78] sm:$0xff] %vm245_vm5, %v482_v47 }
 0x1c5   :  { %511 = vst.msk [vmem:[#allocation2 + $0x78] sm:$0xff] %vm282_vm6, %v506_v46 }
 0x1c8   :  { %v498_v48 = vpop.permute.xlu1 %497 }
 0x1c9   :  { %509 = vst.msk [vmem:[#allocation2 + $0x58] sm:$0xff] %vm282_vm6, %v498_v48 }
 0x1ca   :  { %533 = vst.msk [vmem:[#allocation2 + $0x58] sm:$0xff] %vm319_vm7, %v522_v49 }
 0x1cc   :  { %v502_v50 = vpop.permute.xlu1 %501 }
 0x1cd   :  { %510 = vst.msk [vmem:[#allocation2 + $0x68] sm:$0xff] %vm282_vm6, %v502_v50 }
 0x1d1   :  { %v518_v51 = vpop.permute.xlu1 %517 }
 0x1d2   :  { %532 = vst.msk [vmem:[#allocation2 + $0x48] sm:$0xff] %vm319_vm7, %v518_v51 }
 0x1d5   :  { %v526_v52 = vpop.permute.xlu1 %525 }
 0x1d6   :  { %534 = vst.msk [vmem:[#allocation2 + $0x68] sm:$0xff] %vm319_vm7, %v526_v52 }
 0x1d9   :  { %v530_v53 = vpop.permute.xlu1 %529 }
 0x1da   :  { %535 = vst.msk [vmem:[#allocation2 + $0x78] sm:$0xff] %vm319_vm7, %v530_v53 }
 0x1db   :  { %629 = shalt.err (!%p626_p4)
}
 0x1dc   :  { %s630_s3 = scalar_lea.hbm %s1007_s2, 2048 }
 0x1dd   :  { %p631_p5 = scmp.ne.s32.totalorder %s1007_s2, %s630_s3  ;;  %p634_p6 = scmp.lt.u32.totalorder %s630_s3, %s1007_s2 }
 0x1df   :  { %p636_p7 = pnand %p634_p6, %p631_p5 }
 0x1e1   :  { %639 = shalt.err (!%p636_p7)
}
 0x1e2   :  { %s666_s8 = smov 256  }
 0x1e3   :  { %547 = dma.vmem_to_hbm [thread:$0]  %s542_s27, 2048, %s1007_s2, [#allocation3], %s666_s8, %s666_s8, %s642_s13  }
 0x1e4   :  { %640 = dma.done.wait [#allocation3], 2048  }
 0x1e5   :  { %641 = vsyncadd [#allocation3], 4294965248 }
 0x1e6   :  { %551 = vsyncpa [#allocation3], 1 }

</bundles_post_ra>
